<compile_context>
chip_gen: v7x
topology: tpu7x:2x2x1
jax: 0.10.0
libtpu: 0.0.40
codegen_flags: <defaults>
</compile_context>

<pallas_src>
import functools

import jax
import jax.numpy as jnp
from jax.experimental import pallas as pl
from jax.experimental.pallas import tpu as pltpu

IN_CAST = jnp.float32      # CastModule.in_cast
OUT_CAST = jnp.bfloat16    # CastModule.out_cast
MXU_DTYPE = jnp.bfloat16   # MXU operand dtype (f32 accumulation)


# --------------------------------------------------------------------------
# Kernel
# --------------------------------------------------------------------------
def _cast_linear_kernel(x_ref, w_ref, b_ref, o_ref, acc_ref):
    """Grid (i=M, j=N, k=K).
    x_ref: (tm, tk) bf16, w_ref: (S, tk, tn) bf16 (S=1 plain / S=2 hi+lo),
    b_ref: (1, tn) f32, o_ref: (tm, tn) bf16, acc_ref: (tm, tn) f32 scratch."""
    k = pl.program_id(2)

    @pl.when(k == 0)
    def _init():
        acc_ref[...] = jnp.zeros_like(acc_ref)

    x = x_ref[...]
    # Static unroll over the (1 or 2) bf16 weight planes; both hit the MXU at
    # native bf16 rate and accumulate in f32.
    partial = jnp.dot(x, w_ref[0], preferred_element_type=jnp.float32)
    for t in range(1, w_ref.shape[0]):
        partial += jnp.dot(x, w_ref[t], preferred_element_type=jnp.float32)
    acc_ref[...] += partial

    @pl.when(k == pl.num_programs(2) - 1)
    def _finalize():
        # Bias added exactly once (f32), then out_cast fused with the store.
        o_ref[...] = (acc_ref[...] + b_ref[...]).astype(o_ref.dtype)


# --------------------------------------------------------------------------
# Tiling plan (pure Python on static shapes)
# --------------------------------------------------------------------------
def _round_up(x, m):
    return ((x + m - 1) // m) * m


def _tile_and_pad(dim, target, align):
    """Pick a tile (multiple of `align`, <= target) and a padded extent that
    the tile divides.  Prefers large tiles while keeping padding waste small,
    so a non-divisible dim can never produce a VMEM-busting full-dim tile."""
    d = _round_up(dim, align)
    t = min(_round_up(target, align), d)
    while t > align and _round_up(d, t) - d > max(d // 8, align):
        t -= align
    return t, _round_up(d, t)


def _plan(batch, in_features, out_features, *, tm=512, tn=1024, tk=512):
    tm_, m_pad = _tile_and_pad(batch, tm, 16)          # bf16 sublane packing
    tk_, k_pad = _tile_and_pad(in_features, tk, 128)
    tn_, n_pad = _tile_and_pad(out_features, tn, 128)
    # v7x has 2 TensorCores: ensure a "parallel" grid axis of extent >= 2 when
    # the batch collapses to a single M block (small-batch inference).
    if m_pad // tm_ == 1 and n_pad // tn_ == 1 and n_pad >= 256:
        tn_, n_pad = _tile_and_pad(out_features, n_pad // 2, 128)
    return tm_, tn_, tk_, m_pad, n_pad, k_pad


# --------------------------------------------------------------------------
# One-time parameter preparation (outside the hot jitted forward)
# --------------------------------------------------------------------------
def prepare_linear_params(w, b, plan, *, mxu_precision="bf16"):
    """Transpose W to (in, out), cast (or hi/lo split) to bf16 and zero-pad to
    the planned tile multiples.  Done once per Linear, not per forward call."""
    out_features, in_features = w.shape
    _, _, _, _, n_pad, k_pad = plan

    w_t = jnp.asarray(w, IN_CAST).T                                  # (K, N)
    w_t = jnp.pad(w_t, ((0, k_pad - in_features), (0, n_pad - out_features)))

    if mxu_precision == "bf16":
        w_stack = w_t.astype(MXU_DTYPE)[None]                        # (1, K, N)
    elif mxu_precision == "f32_split":
        w_hi = w_t.astype(MXU_DTYPE)
        w_lo = (w_t - w_hi.astype(IN_CAST)).astype(MXU_DTYPE)
        w_stack = jnp.stack([w_hi, w_lo])                            # (2, K, N)
    else:
        raise ValueError(f"unknown mxu_precision: {mxu_precision}")

    b2 = jnp.pad(jnp.asarray(b, IN_CAST), (0, n_pad - out_features))
    return w_stack, b2.reshape(1, n_pad)


# --------------------------------------------------------------------------
# Forward
# --------------------------------------------------------------------------
@functools.partial(jax.jit, static_argnames=("plan", "out_features"))
def cast_module_forward(x, w_stack, b2, *, plan, out_features):
    """x: (batch, in_features) any float dtype; w_stack/b2 from
    prepare_linear_params.  Returns (batch, out_features) in OUT_CAST."""
    batch, in_features = x.shape
    tm, tn, tk, m_pad, n_pad, k_pad = plan
    s = w_stack.shape[0]

    # in_cast = float32 (lossless for bf16/f16/f32 inputs), then the MXU
    # operand downcast to bf16; both fuse into the padding copy below.
    x = x.astype(IN_CAST).astype(MXU_DTYPE)
    x = jnp.pad(x, ((0, m_pad - batch), (0, k_pad - in_features)))

    grid = (m_pad // tm, n_pad // tn, k_pad // tk)

    cost = pl.CostEstimate(
        flops=2 * s * m_pad * n_pad * k_pad,
        transcendentals=0,
        bytes_accessed=(
            x.size * x.dtype.itemsize * (n_pad // tn)            # x re-reads
            + w_stack.size * w_stack.dtype.itemsize * (m_pad // tm)  # W re-reads
            + b2.size * b2.dtype.itemsize
            + m_pad * n_pad * jnp.dtype(OUT_CAST).itemsize
        ),
    )

    out = pl.pallas_call(
        _cast_linear_kernel,
        out_shape=jax.ShapeDtypeStruct((m_pad, n_pad), OUT_CAST),
        grid_spec=pltpu.PrefetchScalarGridSpec(
            num_scalar_prefetch=0,
            grid=grid,
            in_specs=[
                # x tile: depends on (i, k) only.
                pl.BlockSpec((tm, tk), lambda i, j, k: (i, k)),
                # stacked, pre-transposed bf16 W: depends on (j, k) only,
                # reused across the M axis.  (Sweep pl.Buffered(3) here on
                # v5e if the W DMA ever becomes exposed.)
                pl.BlockSpec((s, tk, tn), lambda i, j, k: (0, k, j)),
                # bias tile: depends on j only.
                pl.BlockSpec((1, tn), lambda i, j, k: (0, j)),
            ],
            out_specs=pl.BlockSpec((tm, tn), lambda i, j, k: (i, j)),
            scratch_shapes=[pltpu.VMEM((tm, tn), jnp.float32)],
        ),
        compiler_params=pltpu.CompilerParams(
            dimension_semantics=("parallel", "parallel", "arbitrary"),
        ),
        cost_estimate=cost,
    )(x, w_stack, b2)

    return out[:batch, :out_features]


# --------------------------------------------------------------------------
# Demo / correctness check
# --------------------------------------------------------------------------
if __name__ == "__main__":
    # Deliberately non-aligned shapes to exercise the padding / tiling plan
    # and the K-reduction accumulator.
    batch, in_features, out_features = 30, 200, 250

    key = jax.random.PRNGKey(0)
    kx, kw, kb = jax.random.split(key, 3)

    # Input in a narrower dtype so in_cast=float32 is meaningful (and lossless).
    x = jax.random.normal(kx, (batch, in_features), dtype=jnp.float32).astype(
        jnp.bfloat16
    )
    bound = 1.0 / (in_features ** 0.5)
    w = jax.random.uniform(
        kw, (out_features, in_features), minval=-bound, maxval=bound,
        dtype=jnp.float32,
    )
    b = jax.random.uniform(
        kb, (out_features,), minval=-bound, maxval=bound, dtype=jnp.float32
    )

    # Small tk target so the demo grid is (1, 2, 2) and exercises the
    # K-reduction; production defaults are tm=512 / tn=1024 / tk=512.
    plan = _plan(batch, in_features, out_features, tm=512, tn=1024, tk=128)

    # Pure-JAX reference of the same CastModule semantics (f32 Linear -> bf16).
    ref = (x.astype(IN_CAST) @ w.astype(IN_CAST).T + b.astype(IN_CAST)).astype(
        OUT_CAST
    )

    for precision, tol in (("bf16", 5e-2), ("f32_split", 2e-2)):
        w_stack, b2 = prepare_linear_params(w, b, plan, mxu_precision=precision)
        out = cast_module_forward(
            x, w_stack, b2, plan=plan, out_features=out_features
        )
        jax.block_until_ready(out)
        assert out.shape == (batch, out_features)
        assert out.dtype == OUT_CAST
        assert jnp.allclose(
            out.astype(jnp.float32), ref.astype(jnp.float32),
            atol=tol, rtol=tol,
        ), f"mismatch in {precision} mode"

    print("KERNEL_OK")
</pallas_src>

<mosaic_0001>
module attributes {stable_mosaic.version = 11 : i64} {
  func.func @_cast_linear_kernel(%arg0: i32, %arg1: i32, %arg2: i32, %arg3: memref<32x128xbf16, #tpu.memory_space<vmem>>, %arg4: memref<1x128x128xbf16, #tpu.memory_space<vmem>>, %arg5: memref<1x128xf32, #tpu.memory_space<vmem>>, %arg6: memref<32x128xbf16, #tpu.memory_space<vmem>>, %arg7: memref<32x128xf32, #tpu.memory_space<vmem>>) attributes {dimension_semantics = [#tpu.dimension_semantics<parallel>, #tpu.dimension_semantics<parallel>, #tpu.dimension_semantics<arbitrary>], iteration_bounds = array<i64: 1, 2, 2>, scalar_prefetch = 0 : i64, scratch_operands = 1 : i64, tpu.core_type = #tpu.core_type<tc>, window_params = [{transform_indices = @transform_0, window_bounds = array<i64: 32, 128>}, {transform_indices = @transform_1, window_bounds = array<i64: 1, 128, 128>}, {transform_indices = @transform_2, window_bounds = array<i64: 1, 128>}, {transform_indices = @transform_3, window_bounds = array<i64: 32, 128>}]} {
    %c0_i32 = arith.constant 0 : i32
    %0 = arith.cmpi eq, %arg2, %c0_i32 : i32
    %1 = arith.extui %0 : i1 to i32
    %c0_i32_0 = arith.constant 0 : i32
    %2 = arith.cmpi ne, %1, %c0_i32_0 : i32
    scf.if %2 {
      %cst_10 = arith.constant 0.000000e+00 : f32
      %13 = vector.broadcast %cst_10 : f32 to vector<32x128xf32>
      %c0_11 = arith.constant 0 : index
      %c0_12 = arith.constant 0 : index
      %14 = vector.load %arg7[%c0_11, %c0_12] : memref<32x128xf32, #tpu.memory_space<vmem>>, vector<32x128xf32>
      tpu.vector_store %arg7[%c0_11, %c0_12], %13 {strides = array<i32>} : memref<32x128xf32, #tpu.memory_space<vmem>>, vector<32x128xf32>,
    } else {
    }
    %c0 = arith.constant 0 : index
    %c0_1 = arith.constant 0 : index
    %3 = vector.load %arg3[%c0, %c0_1] : memref<32x128xbf16, #tpu.memory_space<vmem>>, vector<32x128xbf16>
    %c0_2 = arith.constant 0 : index
    %c0_3 = arith.constant 0 : index
    %c0_4 = arith.constant 0 : index
    %4 = vector.load %arg4[%c0_2, %c0_3, %c0_4] : memref<1x128x128xbf16, #tpu.memory_space<vmem>>, vector<1x128x128xbf16>
    %5 = vector.shape_cast %4 : vector<1x128x128xbf16> to vector<128x128xbf16>
    %cst = arith.constant dense<0.000000e+00> : vector<32x128xf32>
    %6 = tpu.matmul %3, %5, %cst {dimension_numbers = #tpu.dot_dimension_numbers<[1], [0], [0], [1], [0, 0, 1, 1], [], []>} : vector<32x128xbf16>, vector<128x128xbf16>, vector<32x128xf32> -> vector<32x128xf32>
    %c0_5 = arith.constant 0 : index
    %c0_6 = arith.constant 0 : index
    %7 = vector.load %arg7[%c0_5, %c0_6] : memref<32x128xf32, #tpu.memory_space<vmem>>, vector<32x128xf32>
    %8 = arith.addf %7, %6 : vector<32x128xf32>
    %c0_7 = arith.constant 0 : index
    %c0_8 = arith.constant 0 : index
    %9 = vector.load %arg7[%c0_7, %c0_8] : memref<32x128xf32, #tpu.memory_space<vmem>>, vector<32x128xf32>
    tpu.vector_store %arg7[%c0_7, %c0_8], %8 {strides = array<i32>} : memref<32x128xf32, #tpu.memory_space<vmem>>, vector<32x128xf32>,
    %c1_i32 = arith.constant 1 : i32
    %10 = arith.cmpi eq, %arg2, %c1_i32 : i32
    %11 = arith.extui %10 : i1 to i32
    %c0_i32_9 = arith.constant 0 : i32
    %12 = arith.cmpi ne, %11, %c0_i32_9 : i32
    scf.if %12 {
      %c0_10 = arith.constant 0 : index
      %c0_11 = arith.constant 0 : index
      %13 = vector.load %arg7[%c0_10, %c0_11] : memref<32x128xf32, #tpu.memory_space<vmem>>, vector<32x128xf32>
      %c0_12 = arith.constant 0 : index
      %c0_13 = arith.constant 0 : index
      %14 = vector.load %arg5[%c0_12, %c0_13] : memref<1x128xf32, #tpu.memory_space<vmem>>, vector<1x128xf32>
      %15 = vector.broadcast %14 : vector<1x128xf32> to vector<32x128xf32>
      %16 = arith.addf %13, %15 : vector<32x128xf32>
      %17 = arith.truncf %16 : vector<32x128xf32> to vector<32x128xbf16>
      %c0_14 = arith.constant 0 : index
      %c0_15 = arith.constant 0 : index
      %18 = vector.load %arg6[%c0_14, %c0_15] : memref<32x128xbf16, #tpu.memory_space<vmem>>, vector<32x128xbf16>
      tpu.vector_store %arg6[%c0_14, %c0_15], %17 {strides = array<i32>} : memref<32x128xbf16, #tpu.memory_space<vmem>>, vector<32x128xbf16>,
    } else {
    }
    return
  }
  func.func @transform_0(%arg0: i32, %arg1: i32, %arg2: i32) -> (i32, i32) {
    %c0_i32 = arith.constant 0 : i32
    return %arg0, %arg2 : i32, i32
  }
  func.func @transform_1(%arg0: i32, %arg1: i32, %arg2: i32) -> (i32, i32, i32) {
    %c0_i32 = arith.constant 0 : i32
    %c0_i32_0 = arith.constant 0 : i32
    return %c0_i32, %arg2, %arg1 : i32, i32, i32
  }
  func.func @transform_2(%arg0: i32, %arg1: i32, %arg2: i32) -> (i32, i32) {
    %c0_i32 = arith.constant 0 : i32
    %c0_i32_0 = arith.constant 0 : i32
    return %c0_i32, %arg1 : i32, i32
  }
  func.func @transform_3(%arg0: i32, %arg1: i32, %arg2: i32) -> (i32, i32) {
    %c0_i32 = arith.constant 0 : i32
    return %arg0, %arg1 : i32, i32
  }
}

</mosaic_0001>

<bundles_post_ra>
// kernel: cast_module_forward.1
= control target key start
LH: loop header
LB: loop body
LE: loop exit
PB: predicated region body
PF: predicated region fallthrough
CT: control target
= control target key end

     0   :  { %s1342_s0 = inlined_call_operand.vmem [shape: bf16[32,256], index: 0, kind: input, shape index: {}]   ;;  %s1343_s1 = inlined_call_operand.hbm [shape: bf16[1,256,256], index: 1, kind: input, shape index: {}]   ;;  %s1344_s2 = inlined_call_operand.vmem [shape: f32[1,256], index: 2, kind: input, shape index: {}]   ;;  %s1345_s3 = inlined_call_operand.hbm [shape: bf16[32,256], index: 3, kind: output, shape index: {}]  }
   0x1   :  { %1350 = sst [smem:[#allocation15_spill]] %s1342_s0 }
   0x2   :  { %8 = vsyncpa [#allocation5], 0 }
   0x3   :  { %10 = vsyncpa [#allocation5 + $0x1], 0 }
   0x4   :  { %11 = vsyncpa [#allocation6], 0 }
   0x5   :  { %13 = vsyncpa [#allocation6 + $0x1], 0  ;;  %s1042_s12 = smov 0   ;;  %s1044_s13 = smov 0  }
   0x6   :  { %s1046_s14 = smov 0   ;;  %s1048_s15 = smov 0  }
   0x7   :  { %s1050_s16 = smov 0   ;;  %s1052_s17 = smov 0  }
   0x8   :  { %s1054_s18 = smov 0   ;;  %s1056_s19 = smov 0  }
   0x9   :  { %s1058_s20 = smov 0   ;;  %s1060_s21 = smov 0  }
   0xa   :  { %s1062_s22 = smov 0   ;;  %s1064_s23 = smov 0  }
   0xb   :  { %s1066_s24 = smov 0  }
   0xc LB: > { %1351 = sst [smem:[#allocation10_spill]] %s991_s19  ;;  %s634_s25 = sadd.s32 4294967295, %s1011_s24   ;;  %s1011_s24 = sphi %s1066_s24, %s19_s24   ;;  %s1007_s23 = sphi %s1064_s23, %s1381_s23   ;;  %s1003_s22 = sphi %s1062_s22, %s1380_s22   ;;  %s999_s21 = sphi %s1060_s21, %s1379_s21   ;;  %s995_s20 = sphi %s1058_s20, %s1378_s20   ;;  %s991_s19 = sphi %s1056_s19, %s1368_s19   ;;  %s987_s18 = sphi %s1054_s18, %s1367_s18   ;;  %s983_s17 = sphi %s1052_s17, %s1377_s17   ;;  %s979_s16 = sphi %s1050_s16, %s1376_s16   ;;  %s975_s15 = sphi %s1048_s15, %s1375_s15   ;;  %s971_s14 = sphi %s1046_s14, %s1374_s14   ;;  %s967_s13 = sphi %s1044_s13, %s1373_s13   ;;  %s963_s12 = sphi %s1042_s12, %s1372_s12  }
   0xd   : > { %s31_s27 = sadd.s32 1, %s1003_s22  ;;  %s34_s28 = sadd.s32 1, %s1007_s23 }
   0xe   : > { %p32_p0 = scmp.ge.s32.totalorder %s31_s27, 2  ;;  %s47_s29 = sadd.s32 1, %s991_s19 }
   0xf   : > { %p54_p1 = scmp.ne.s32.totalorder %s991_s19, %s987_s18  ;;  %p55_p2 = scmp.eq.s32.totalorder %s1011_s24, 0 }
  0x10   : > { %s1383_s27 = smov (%p32_p0, %s31_s27), 0  ;;  %s1385_s28 = smov (!%p32_p0, %s34_s28), %s1007_s23 }
  0x11   : > { %1352 = sst [smem:[#allocation11_spill]] %s1383_s27  ;;  %s43_s30 = ssub.s32 %s1003_s22, %s1383_s27 }
  0x12   : > { %p1120_p3 = por %p55_p2, %p54_p1  ;;  %p36_p4 = scmp.ge.s32.totalorder %s1385_s28, 2 }
  0x13   : > { %p45_p5 = scmp.eq.s32.totalorder %s43_s30, 0  ;;  %s75_s5 = sadd.s32 1, %s983_s17 }
  0x14   : > { %p82_p6 = scmp.ne.s32.totalorder %s983_s17, %s979_s16  ;;  %s1387_s28 = smov (%p36_p4, %s1385_s28), 0 }
  0x15   : > { %1354 = sst [smem:[#allocation12_spill]] %s1387_s28  ;;  %s71_s7 = ssub.s32 %s1007_s23, %s1387_s28 }
  0x16   : > { %s1130_s6 = scalar_select %p45_p5, %s991_s19, %s47_s29  }
  0x17   : > { %p1134_p7 = por %p82_p6, %p55_p2  ;;  %s72_s9 = sor.u32 %s71_s7, %s43_s30 }
  0x18   : > { %1355 = sst [smem:[#allocation13_spill]] %s1130_s6  ;;  %p88_p8 = scmp.ne.s32.totalorder %s979_s16, %s975_s15 }
  0x19   : > { %p73_p9 = scmp.eq.s32.totalorder %s72_s9, 0  ;;  %p89_p10 = scmp.eq.s32.totalorder %s634_s25, 0 }
  0x1a   : > { %p127_p11 = scmp.eq.s32.totalorder %s71_s7, 0  ;;  %s129_s10 = sadd.s32 1, %s971_s14 }
  0x1b   : > { %s1144_s11 = scalar_select %p73_p9, %s983_s17, %s75_s5  }
  0x1c   : > { %p1146_p12 = por %p89_p10, %p88_p8  ;;  %p139_p13 = scmp.ne.s32.totalorder %s971_s14, %s967_s13 }
  0x1d   : > { %1357 = sst [smem:[#allocation14_spill]] %s1144_s11  ;;  %p140_p0 = scmp.eq.s32.totalorder %s634_s25, 3 }
  0x1e   : > { %s1153_s29 = scalar_select %p127_p11, %s971_s14, %s129_s10  }
  0x1f   : > { %p145_p1 = scmp.ne.s32.totalorder %s967_s13, %s963_s12  ;;  %s1359_s28 = sadd.s32 4294967294, %s1011_s24  }
  0x20   : > { %p146_p2 = scmp.eq.s32.totalorder %s1359_s28, 3  ;;  %p1161_p4 = por %p140_p0, %p139_p13 }
  0x21   : > { %p637_p6 = scmp.ge.s32.totalorder %s1011_s24, 4 }
  0x22   : > { %s1360_s15 = scalar_select %p1161_p4, 1, 0 }
  0x23   : > { %p1165_p5 = por %p146_p2, %p145_p1  ;;  %162 = sbr.rel (%p637_p6) target bundleno = 82 (0x52), region = 16 }
  0x25   : > { %s1361_s30 = scalar_select %p1165_p5, 1, 0 }
  0x2a   : > { %165 = sbr.rel (!%p1120_p3) target bundleno = 54 (0x36), region = 20  ;;  %s167_s25 = sand.u32 (%p1120_p3), 1, %s991_s19  }
  0x2b   : > { %s639_s5 = sshll.u32 (%p1120_p3), %s1003_s22, 2  ;;  %s638_s7 = sshll.u32 (%p1120_p3), %s167_s25, 4 }
  0x2c   : > { %s1362_s0 = sld [smem:[#allocation15_spill]] (%p1120_p3)  ;;  %s169_s27 = scalar_lea.vmem (%p1120_p3), [#allocation3], %s638_s7 }
  0x32   : > { %s174_s10 = scalar_lea.vmem %s1362_s0, %s639_s5 }
  0x33   : > { %v190_v0 = vld [vmem:[%s174_s10] sm:$0xf]  ;;  %v192_v1 = vld [vmem:[%s174_s10 + $0x8] sm:$0xf]  ;;  %v194_v2 = vld [vmem:[%s174_s10 + $0x10] sm:$0xf] }
  0x34   : > { %191 = vst [vmem:[%s169_s27] sm:$0xf] %v190_v0  ;;  %193 = vst [vmem:[%s169_s27 + $0x4] sm:$0xf] %v192_v1  ;;  %v196_v3 = vld [vmem:[%s174_s10 + $0x18] sm:$0xf] }
  0x35   : > { %195 = vst [vmem:[%s169_s27 + $0x8] sm:$0xf] %v194_v2  ;;  %197 = vst [vmem:[%s169_s27 + $0xc] sm:$0xf] %v196_v3 }
  0x36 PF: > { %s229_s4 = sand.u32 1, %s983_s17   ;;  %s669_s25 = sshll.u32 %s1003_s22, 5 }
  0x37   : > { %s640_s6 = sshll.u32 %s229_s4, 6  ;;  %s239_s19 = sadd.s32 %s1007_s23, %s669_s25 }
  0x38   : > { %s643_s28 = sshll.u32 %s239_s19, 6  ;;  %s233_s5 = scalar_lea.vmem [#allocation4], %s640_s6 }
  0x39   : > { %s242_s9 = sshll.u32 %s233_s5, 4  ;;  %s1183_s11 = scalar_lea.hbm %s1343_s1, %s643_s28  ;;  %s1185_s9 = int_to_ptr.vmem [resolvable:$true] %s242_s9 }
  0x3a   : > { %s1187_s27 = scalar_lea.sflag [#allocation5], %s229_s4  ;;  %s845_s10 = scalar_lea.hbm %s1183_s11, 1024 }
  0x3b   : > { %p846_p3 = scmp.ne.s32.totalorder %s1183_s11, %s845_s10  ;;  %s849_s25 = scalar_lea.hbm %s1343_s1, 4096 }
  0x3c   : > { %p850_p10 = scmp.lt.u32.totalorder %s1183_s11, %s1343_s1  ;;  %p851_p11 = scmp.lt.u32.totalorder %s849_s25, %s845_s10 }
  0x3d   : > { %p847_p8 = pnand %p846_p3, %p1134_p7  ;;  %p853_p0 = scmp.lt.u32.totalorder %s845_s10, %s1183_s11 }
  0x3e   : > { %p852_p13 = por %p851_p11, %p850_p10 }
  0x3f   : > { %p848_p9 = pneg %p847_p8 }
  0x40   : > { %p854_p1 = por %p853_p0, %p852_p13 }
  0x42   : > { %p855_p2 = pnand %p854_p1, %p848_p9 }
  0x44   : > { %858 = shalt.err (!%p855_p2)
}
  0x45   : > { %s859_s4 = scalar_lea.vmem %s1185_s9, 1024  ;;  %s1013_s5 = smov [#allocation4]  }
  0x46   : > { %p860_p6 = scmp.ne.s32.totalorder %s1185_s9, %s859_s4  ;;  %s863_s7 = sshll.u32 %s1013_s5, 4  ;;  %s864_s7 = int_to_ptr.vmem [resolvable:$false] %s863_s7 }
  0x47   : > { %s865_s19 = scalar_lea.vmem %s864_s7, 2048  ;;  %p866_p5 = scmp.lt.s32.totalorder %s1185_s9, %s864_s7 }
  0x48   : > { %p861_p3 = pnand %p860_p6, %p1134_p7  ;;  %p867_p4 = scmp.lt.s32.totalorder %s865_s19, %s859_s4 }
  0x4a   : > { %p862_p8 = pneg %p861_p3  ;;  %p868_p10 = por %p867_p4, %p866_p5 }
  0x4c   : > { %p869_p11 = pnand %p868_p10, %p862_p8 }
  0x4e   : > { %872 = shalt.err (!%p869_p11)
}
  0x4f   : > { %s1014_s10 = smov 128   ;;  %s1015_s6 = smov 64  }
  0x50   : > { %s1016_s25 = smov 4  }
  0x51   : > { %715 = dma.hbm_to_vmem [thread:$0]  (%p1134_p7), %s1183_s11, 1024, %s1185_s9, %s1187_s27, %s1014_s10, %s1015_s6, %s1016_s25  }
  0x52 PF: > { %p644_p9 = scmp.ge.s32.totalorder %s1011_s24, 1  ;;  %p256_p13 = scmp.lt.s32.totalorder %s1011_s24, 5 }
  0x54   : > { %p257_p0 = pnand %p644_p9, %p256_p13 }
  0x55   : > { %s263_s0 = sand.u32 (!%p257_p0), 1, %s987_s18   ;;  %s269_s28 = sand.u32 (!%p257_p0), 1, %s979_s16  }
  0x56   : > { %260 = sbr.rel (%p257_p0) target bundleno = 394 (0x18a), region = 69  ;;  %s1215_s4 = sshll.u32 (!%p257_p0), %s263_s0, 4 }
  0x57   : > { %s646_s5 = sshll.u32 (!%p257_p0), %s269_s28, 6  ;;  %s265_s7 = scalar_lea.vmem (!%p257_p0), [#allocation3], %s1215_s4 }
  0x58   : > { %s270_s19 = scalar_lea.sflag (!%p257_p0), [#allocation5], %s269_s28  ;;  %s1218_s8 = scalar_lea.vmem (!%p257_p0), [#allocation4], %s646_s5 }
  0x5d   : > { %954 = dma.done.wait (%p1146_p12), %s270_s19, 1024  }
  0x5e   : > { %956 = vsyncadd (%p1146_p12), %s270_s19, 4294966272  ;;  %s300_s11 = sand.u32 1, %s967_s13   ;;  %p305_p7 = scmp.lt.s32.totalorder %s999_s21, 1 }
  0x5f   : > { %s647_s18 = sshll.u32 %s300_s11, 4  ;;  %p648_p4 = scmp.ne.s32.totalorder %s995_s20, 0 }
  0x60   : > { %s1229_s9 = scalar_select %p305_p7, %s999_s21, 1 }
  0x61   : > { %s1235_s25 = scalar_lea.vmem [#allocation7], %s647_s18  ;;  %313 = sbr.rel (%p648_p4) target bundleno = 104 (0x68), region = 81  ;;  %v1017_v4 = vmov (!%p648_p4), 0.0  }
  0x62   : > { %s307_s6 = scalar_lea.vmem %s1344_s2, %s1229_s9  ;;  %314 = vst [vmem:[#allocation2] sm:$0xff] (!%p648_p4), %v1017_v4  ;;  %315 = vst [vmem:[#allocation2 + $0x8] sm:$0xff] (!%p648_p4), %v1017_v4 }
  0x63   : > { %316 = vst [vmem:[#allocation2 + $0x10] sm:$0xff] (!%p648_p4), %v1017_v4  ;;  %317 = vst [vmem:[#allocation2 + $0x18] sm:$0xff] (!%p648_p4), %v1017_v4 }
  0x68 PF: > { %v835_v5 = vld [vmem:[%s1218_s8] sm:$0xff]   ;;  %v836_v6 = vld [vmem:[%s1218_s8 + $0x8] sm:$0xff]   ;;  %v837_v7 = vld [vmem:[%s1218_s8 + $0x10] sm:$0xff]   ;;  %p659_p12 = scmp.ne.s32.totalorder %s995_s20, 1 }
  0x69   : > { %695 = vmatprep.subr.bf16.mxu0 %v835_v5  ;;  %v838_v8 = vld [vmem:[%s1218_s8 + $0x18] sm:$0xff]   ;;  %v843_v9 = vld [vmem:[%s265_s7] sm:$0xff]   ;;  %v840_v11 = vld [vmem:[%s1218_s8 + $0x28] sm:$0xff]  }
  0x6a   : > { %696 = vmatpush3.bf16.msra.mxu0 %v835_v5  ;;  %711 = vmatprep.mubr.bf16.mxu0 %v843_v9  ;;  %v839_v10 = vld [vmem:[%s1218_s8 + $0x20] sm:$0xff]   ;;  %v841_v12 = vld [vmem:[%s1218_s8 + $0x30] sm:$0xff]   ;;  %v842_v13 = vld [vmem:[%s1218_s8 + $0x38] sm:$0xff]  }
  0x6b   : > { %697 = vmatprep.subr.bf16.mxu0 %v836_v6  ;;  %v844_v14 = vld [vmem:[%s265_s7 + $0x8] sm:$0xff]   ;;  %v449_v15 = vld [vmem:[#allocation2 + $0x10] sm:$0xff]  ;;  %v447_v16 = vld [vmem:[#allocation2] sm:$0xff] }
  0x6c   : > { %v450_v18 = vld [vmem:[#allocation2 + $0x18] sm:$0xff]  ;;  %v448_v21 = vld [vmem:[#allocation2 + $0x8] sm:$0xff]  ;;  %v660_v29 = vld [vmem:[%s307_s6] ss:$0 sm:$0xff] (!%p659_p12) }
  0x6e   : > { %698 = vmatpush3.bf16.msra.mxu0 %v836_v6 }
  0x6f   : > { %699 = vmatprep.subr.bf16.mxu0 %v837_v7 }
  0x72   : > { %700 = vmatpush3.bf16.msra.mxu0 %v837_v7 }
  0x73   : > { %701 = vmatprep.subr.bf16.mxu0 %v838_v8 }
  0x76   : > { %702 = vmatpush3.bf16.msra.mxu0 %v838_v8 }
  0x77   : > { %703 = vmatprep.subr.bf16.mxu0 %v839_v10 }
  0x7a   : > { %704 = vmatpush3.bf16.msra.mxu0 %v839_v10 }
  0x7b   : > { %705 = vmatprep.subr.bf16.mxu0 %v840_v11 }
  0x7e   : > { %706 = vmatpush3.bf16.msra.mxu0 %v840_v11 }
  0x7f   : > { %707 = vmatprep.subr.bf16.mxu0 %v841_v12 }
  0x82   : > { %708 = vmatpush3.bf16.msra.mxu0 %v841_v12 }
  0x83   : > { %709 = vmatprep.subr.bf16.mxu0 %v842_v13 }
  0x86   : > { %710 = vmatpush3.bf16.msra.mxu0 %v842_v13 }
  0x89   : > { %712 = vmatmul.mubr.bf16.vlgmr.msra.gmra.mrb[0].mxu0 %v844_v14 }
 0x15c   : > { %v713_v17 = vpop.f32.mrb[0].mxu0  ;;  %462 = sbr.rel (%p659_p12) target bundleno = 367 (0x16f), region = 85 }
 0x15d   : > { %v453_v19 = vadd.f32 %v713_v17, %v449_v15  ;;  %v432_v20 = vpop.f32.mrb[1].mxu0 }
 0x15e   : > { %v451_v22 = vadd.f32 %v447_v16, %v432_v20  ;;  %v714_v23 = vpop.f32.mrb[2].mxu0 }
 0x15f   : > { %457 = vst [vmem:[#allocation2 + $0x10] sm:$0xff] %v453_v19  ;;  %v454_v24 = vadd.f32 %v714_v23, %v450_v18  ;;  %v435_v25 = vpop.f32.mrb[3].mxu0 }
 0x160   : > { %455 = vst [vmem:[#allocation2] sm:$0xff] %v451_v22  ;;  %v452_v26 = vadd.f32 %v448_v21, %v435_v25 }
 0x161   : > { %458 = vst [vmem:[#allocation2 + $0x18] sm:$0xff] %v454_v24 }
 0x162   : > { %456 = vst [vmem:[#allocation2 + $0x8] sm:$0xff] %v452_v26 }
 0x166   : > { %v465_v32 = vld [vmem:[#allocation2 + $0x10] sm:$0xff] }
 0x167   : > { %v463_v27 = vld [vmem:[#allocation2] sm:$0xff]  ;;  %v476_v34 = vadd.f32 %v660_v29, %v465_v32 }
 0x168   : > { %v474_v30 = vadd.f32 %v660_v29, %v463_v27  ;;  %v466_v33 = vld [vmem:[#allocation2 + $0x18] sm:$0xff] }
 0x169   : > { %v464_v28 = vld [vmem:[#allocation2 + $0x8] sm:$0xff]  ;;  %v477_v35 = vadd.f32 %v660_v29, %v466_v33 }
 0x16a   : > { %v475_v31 = vadd.f32 %v660_v29, %v464_v28 }
 0x16b   : > { %v682_v37 = vpack.c.bf16 %v477_v35, %v476_v34 }
 0x16c   : > { %v677_v36 = vpack.c.bf16 %v475_v31, %v474_v30 }
 0x16d   : > { %684 = vst [vmem:[%s1235_s25 + $0x8] sm:$0xff] %v682_v37  }
 0x16e   : > { %678 = vst [vmem:[%s1235_s25] sm:$0xff] %v677_v36  }
 0x16f PF: > { %s666_s20 = sshll.u32 %s999_s21, 6  ;;  %s514_s7 = sshll.u32 %s1235_s25, 4  ;;  %s1265_s7 = int_to_ptr.vmem [resolvable:$true] %s514_s7 }
 0x170   : > { %s1262_s5 = scalar_lea.hbm %s1345_s3, %s666_s20  ;;  %s1269_s19 = scalar_lea.sflag [#allocation6], %s300_s11 }
 0x171   : > { %s873_s8 = scalar_lea.vmem %s1265_s7, 256  ;;  %p1363_p1 = scmp.ne.s32.totalorder %s1360_s15, 0 }
 0x172   : > { %p874_p5 = scmp.ne.s32.totalorder %s1265_s7, %s873_s8  ;;  %s1018_s21 = smov [#allocation7]  }
 0x173   : > { %s877_s18 = sshll.u32 %s1018_s21, 4  ;;  %s878_s18 = int_to_ptr.vmem [resolvable:$false] %s877_s18 }
 0x174   : > { %p875_p2 = pnand %p874_p5, %p1363_p1  ;;  %s879_s9 = scalar_lea.vmem %s878_s18, 512 }
 0x175   : > { %p880_p3 = scmp.lt.s32.totalorder %s1265_s7, %s878_s18  ;;  %p881_p8 = scmp.lt.s32.totalorder %s879_s9, %s873_s8 }
 0x176   : > { %p876_p6 = pneg %p875_p2 }
 0x177   : > { %p882_p10 = por %p881_p8, %p880_p3 }
 0x179   : > { %p883_p11 = pnand %p882_p10, %p876_p6 }
 0x17b   : > { %886 = shalt.err (!%p883_p11)
}
 0x17c   : > { %s887_s11 = scalar_lea.hbm %s1262_s5, 256  ;;  %s891_s6 = scalar_lea.hbm %s1345_s3, 512 }
 0x17d   : > { %p888_p9 = scmp.ne.s32.totalorder %s1262_s5, %s887_s11  ;;  %p892_p7 = scmp.lt.u32.totalorder %s1262_s5, %s1345_s3 }
 0x17e   : > { %p893_p4 = scmp.lt.u32.totalorder %s891_s6, %s887_s11  ;;  %p895_p5 = scmp.lt.u32.totalorder %s887_s11, %s1262_s5 }
 0x17f   : > { %p889_p13 = pnand %p888_p9, %p1363_p1 }
 0x180   : > { %p894_p12 = por %p893_p4, %p892_p7 }
 0x181   : > { %p890_p0 = pneg %p889_p13 }
 0x182   : > { %p896_p2 = por %p895_p5, %p894_p12 }
 0x184   : > { %p897_p6 = pnand %p896_p2, %p890_p0 }
 0x186   : > { %900 = shalt.err (!%p897_p6)
}
 0x187   : > { %s1019_s0 = smov 64   ;;  %s1020_s20 = smov 128  }
 0x188   : > { %s1021_s28 = smov 4  }
 0x189   : > { %717 = dma.vmem_to_hbm [thread:$0]  (%p1363_p1), %s1265_s7, 256, %s1262_s5, %s1269_s19, %s1019_s0, %s1020_s20, %s1021_s28  }
 0x18a PF: > { %p723_p3 = scmp.ge.s32.totalorder %s1011_s24, 2  ;;  %s529_s4 = sand.u32 1, %s963_s12  }
 0x18b   : > { %p1364_p8 = scmp.ne.s32.totalorder %s1361_s30, 0  ;;  %s530_s8 = scalar_lea.sflag [#allocation6], %s529_s4 }
 0x18d   : > { %p720_p10 = pnand %p723_p3, %p1364_p8 }
 0x18f   : > { %958 = dma.done.wait (!%p720_p10), %s530_s8, 256  }
 0x190   : > { %960 = vsyncadd (!%p720_p10), %s530_s8, 4294967040  ;;  %s19_s24 = sadd.s32 1, %s1011_s24   ;;  %s1366_s5 = sld [smem:[#allocation14_spill]] }
 0x191   : > { %p1298_p11 = scmp.ge.s32.totalorder %s19_s24, 6   ;;  %s1367_s18 = sld [smem:[#allocation10_spill]] }
 0x192   : > { %s1368_s19 = sld [smem:[#allocation13_spill]]  ;;  %s1369_s30 = sld [smem:[#allocation11_spill]] }
 0x193   : > { %s1370_s7 = sld [smem:[#allocation12_spill]]  ;;  %s1372_s12 = smov %s967_s13 }
 0x194   : > { %s1373_s13 = smov %s971_s14  ;;  %s1374_s14 = smov %s1153_s29 }
 0x195   : > { %s1375_s15 = smov %s979_s16  ;;  %s1376_s16 = smov %s983_s17 }
 0x196   : > { %s1377_s17 = smov %s1366_s5  ;;  %s1378_s20 = smov %s1003_s22 }
 0x197   : > { %s1379_s21 = smov %s1007_s23  ;;  %18 = sbr.rel (!%p1298_p11) target bundleno = 12 (0xc), region = 137 }
 0x198   : > { %s1380_s22 = smov %s1369_s30 }
 0x199   : > { %s1381_s23 = smov %s1370_s7 }
 0x19e   :  { %535 = vsyncpa [#allocation5], 1 }
 0x19f   :  { %537 = vsyncpa [#allocation5 + $0x1], 1 }
 0x1a0   :  { %538 = vsyncpa [#allocation6], 1 }
 0x1a1   :  { %540 = vsyncpa [#allocation6 + $0x1], 1 }

</bundles_post_ra>
